<compile_context>
chip_gen: v7x
topology: tpu7x:2x2x1
jax: 0.10.0
libtpu: 0.0.40
codegen_flags: <defaults>
</compile_context>

<pallas_src>
import jax
import jax.numpy as jnp
from jax.experimental import pallas as pl
from jax.experimental.pallas import tpu as pltpu


def ffn_kernel(x_ref, w1_ref, b1_ref, w2_ref, b2_ref, o_ref, acc_ref):
    k = pl.program_id(1)

    @pl.when(k == 0)
    def _init():
        acc_ref[...] = jnp.zeros_like(acc_ref)

    # In-kernel cast of x to the MXU compute dtype (hidden under the matmuls).
    x = x_ref[...].astype(w1_ref.dtype)
    # First linear chunk: (tm, d_model) @ (d_model, tk_ff), f32 accumulate.
    h = jnp.dot(x, w1_ref[...], preferred_element_type=jnp.float32)
    h = jnp.maximum(h + b1_ref[...], 0.0)  # bias + ReLU (elementwise in d_ff)
    # (inference) dropout == identity
    # Second linear chunk: (tm, tk_ff) @ (tk_ff, d_model), accumulate in f32.
    acc_ref[...] += jnp.dot(h.astype(w2_ref.dtype), w2_ref[...],
                            preferred_element_type=jnp.float32)

    @pl.when(k == pl.num_programs(1) - 1)
    def _finalize():
        o_ref[...] = (acc_ref[...] + b2_ref[...]).astype(o_ref.dtype)


def _round_up(n, m):
    return ((n + m - 1) // m) * m


def _vmem_capacity_bytes():
    try:
        return int(pltpu.get_tpu_info().vmem_capacity_bytes)
    except Exception:
        return 128 << 20  # v5e/v6e physical VMEM; conservative fallback


def _default_block_m():
    # Ridge points with streamed weights (AI ~ block_m flops/byte):
    #   v5e ~256, v6e ~640, v7x ~320; stay above with margin where VMEM allows.
    try:
        kind = jax.devices()[0].device_kind.lower()
    except Exception:
        kind = ""
    if "v7" in kind:
        return 384   # keep tiles modest for 64 MiB per-TC VMEM
    if "v5" in kind:
        return 512
    return 768       # v6e default


def positionwise_feed_forward(x, w1, b1, w2, b2, *, block_m=None, block_ff=512,
                              compute_dtype=jnp.bfloat16, out_dtype=None):
    """x: (batch, seq, d_model); w1: (d_model, d_ff); b1: (d_ff,);
    w2: (d_ff, d_model); b2: (d_model,). Returns (batch, seq, d_model)."""
    batch, seq, d_model = x.shape
    d_ff = w1.shape[1]
    out_dtype = x.dtype if out_dtype is None else out_dtype
    M = batch * seq

    if block_m is None:
        block_m = _default_block_m()

    # Token tile: multiple of 16 (bf16 sublane packing), bounded by padded M.
    tm = max(16, min(block_m, _round_up(M, 16)))
    tm = _round_up(tm, 16)
    m_pad = _round_up(M, tm)

    # d_ff tile: multiple of 128 (lane-dense W1 tile / sublane-dense W2 tile).
    tk = max(128, min(block_ff, _round_up(d_ff, 128)))
    tk = _round_up(tk, 128)
    ff_pad = _round_up(d_ff, tk)

    # d_model padded to a lane multiple so the output block is stored unmasked.
    dm_pad = _round_up(d_model, 128)

    grid = (m_pad // tm, ff_pad // tk)

    # Flatten tokens; pad only if needed (x stays in its original dtype — the
    # bf16 cast happens inside the kernel, hidden under the MXU).
    x2d = x.reshape(M, d_model)
    if m_pad != M or dm_pad != d_model:
        x2d = jnp.pad(x2d, ((0, m_pad - M), (0, dm_pad - d_model)))

    # Weights: expected pre-cast to compute_dtype by the caller (avoids a full
    # HBM read+write per call); cast here only as a fallback.
    w1c = w1 if w1.dtype == compute_dtype else w1.astype(compute_dtype)
    w2c = w2 if w2.dtype == compute_dtype else w2.astype(compute_dtype)
    if dm_pad != d_model or ff_pad != d_ff:
        w1c = jnp.pad(w1c, ((0, dm_pad - d_model), (0, ff_pad - d_ff)))
        w2c = jnp.pad(w2c, ((0, ff_pad - d_ff), (0, dm_pad - d_model)))
    b1_2d = b1.astype(jnp.float32).reshape(1, d_ff)
    b2_2d = b2.astype(jnp.float32).reshape(1, d_model)
    if ff_pad != d_ff:
        b1_2d = jnp.pad(b1_2d, ((0, 0), (0, ff_pad - d_ff)))
    if dm_pad != d_model:
        b2_2d = jnp.pad(b2_2d, ((0, 0), (0, dm_pad - d_model)))

    x_sz = jnp.dtype(x2d.dtype).itemsize
    c_sz = jnp.dtype(compute_dtype).itemsize
    o_sz = jnp.dtype(out_dtype).itemsize

    # VMEM budget for the actual residency (streamed weight tiles, resident x
    # tile, f32 accumulator, double-buffered in/out), capped by physical VMEM.
    vmem_bytes = (
        2 * tm * dm_pad * x_sz            # x tiles (double-buffered)
        + 2 * dm_pad * tk * c_sz          # W1 tiles (double-buffered)
        + 2 * tk * dm_pad * c_sz          # W2 tiles (double-buffered)
        + 2 * 8 * (tk + dm_pad) * 4       # biases (sublane-padded, 2 buffers)
        + 2 * tm * dm_pad * o_sz          # out tiles (double-buffered)
        + tm * dm_pad * 4                 # f32 accumulator scratch
        + tm * tk * 4                     # f32 intermediate h headroom
        + (8 << 20)                       # slack
    )
    cap = _vmem_capacity_bytes() - (8 << 20)
    vmem_bytes = min(max(int(vmem_bytes), 32 << 20), cap)

    # Advisory cost so XLA schedules the surrounding pad/slice/reshape around
    # the long custom call. Weights are re-streamed once per M tile.
    cost = pl.CostEstimate(
        flops=4 * M * d_model * d_ff,
        transcendentals=0,
        bytes_accessed=int(
            m_pad * dm_pad * (x_sz + o_sz)
            + grid[0] * 2 * dm_pad * ff_pad * c_sz
            + (ff_pad + dm_pad) * 4),
    )

    out = pl.pallas_call(
        ffn_kernel,
        out_shape=jax.ShapeDtypeStruct((m_pad, dm_pad), out_dtype),
        grid_spec=pltpu.PrefetchScalarGridSpec(
            num_scalar_prefetch=0,
            grid=grid,
            in_specs=[
                # x tile is invariant along k -> stays resident across the
                # d_ff reduction; weights/biases stream along k.
                pl.BlockSpec((tm, dm_pad), lambda i, k: (i, 0)),
                pl.BlockSpec((dm_pad, tk), lambda i, k: (0, k)),
                pl.BlockSpec((1, tk), lambda i, k: (0, k)),
                pl.BlockSpec((tk, dm_pad), lambda i, k: (k, 0)),
                pl.BlockSpec((1, dm_pad), lambda i, k: (0, 0)),
            ],
            out_specs=pl.BlockSpec((tm, dm_pad), lambda i, k: (i, 0)),
            scratch_shapes=[pltpu.VMEM((tm, dm_pad), jnp.float32)],
        ),
        compiler_params=pltpu.CompilerParams(
            # Token tiles independent (shard across v7x's 2 TCs); d_ff axis is
            # the reduction -> "arbitrary", innermost.
            dimension_semantics=("parallel", "arbitrary"),
            vmem_limit_bytes=vmem_bytes,
        ),
        cost_estimate=cost,
    )(x2d, w1c, b1_2d, w2c, b2_2d)

    if m_pad != M or dm_pad != d_model:
        out = out[:M, :d_model]
    return out.reshape(batch, seq, d_model)


if __name__ == "__main__":
    # Small but lane-dense shapes (d_model is a full 128-lane multiple so the
    # output store path is unmasked); block_m=64 / block_ff=128 exercise the
    # tiled, pipelined M x d_ff grid (grid = (4, 2)) at small scale.
    batch, seq, d_model, d_ff = 2, 128, 128, 256

    key = jax.random.PRNGKey(0)
    kx, kw1, kb1, kw2, kb2 = jax.random.split(key, 5)

    x = jax.random.normal(kx, (batch, seq, d_model), dtype=jnp.float32)
    # Deterministic synthetic params, stored as (in, out) = transposed PyTorch
    # nn.Linear weights.  Weights pre-cast to bf16 once (outside the hot path).
    w1 = (jax.random.normal(kw1, (d_model, d_ff), dtype=jnp.float32) * 0.05)
    b1 = jax.random.normal(kb1, (d_ff,), dtype=jnp.float32) * 0.05
    w2 = (jax.random.normal(kw2, (d_ff, d_model), dtype=jnp.float32) * 0.05)
    b2 = jax.random.normal(kb2, (d_model,), dtype=jnp.float32) * 0.05
    w1_bf16 = w1.astype(jnp.bfloat16)
    w2_bf16 = w2.astype(jnp.bfloat16)

    y = positionwise_feed_forward(x, w1_bf16, b1, w2_bf16, b2,
                                  block_m=64, block_ff=128)
    jax.block_until_ready(y)

    # Reference with matching bf16 rounding of matmul operands (f32 accumulate);
    # dropout = identity at eval.
    xb = x.astype(jnp.bfloat16).astype(jnp.float32)
    w1b = w1_bf16.astype(jnp.float32)
    w2b = w2_bf16.astype(jnp.float32)
    h = jnp.maximum(xb @ w1b + b1, 0.0)
    ref = h.astype(jnp.bfloat16).astype(jnp.float32) @ w2b + b2
    assert jnp.allclose(y, ref, atol=2e-3, rtol=2e-3), "mismatch vs reference"

    print("KERNEL_OK")
</pallas_src>

<mosaic_0001>
module attributes {stable_mosaic.version = 11 : i64} {
  func.func @ffn_kernel(%arg0: i32, %arg1: i32, %arg2: memref<64x128xf32, #tpu.memory_space<vmem>>, %arg3: memref<128x128xbf16, #tpu.memory_space<vmem>>, %arg4: memref<1x128xf32, #tpu.memory_space<vmem>>, %arg5: memref<128x128xbf16, #tpu.memory_space<vmem>>, %arg6: memref<1x128xf32, #tpu.memory_space<vmem>>, %arg7: memref<64x128xf32, #tpu.memory_space<vmem>>, %arg8: memref<64x128xf32, #tpu.memory_space<vmem>>) attributes {dimension_semantics = [#tpu.dimension_semantics<parallel>, #tpu.dimension_semantics<arbitrary>], iteration_bounds = array<i64: 4, 2>, scalar_prefetch = 0 : i64, scratch_operands = 1 : i64, tpu.core_type = #tpu.core_type<tc>, window_params = [{transform_indices = @transform_0, window_bounds = array<i64: 64, 128>}, {transform_indices = @transform_1, window_bounds = array<i64: 128, 128>}, {transform_indices = @transform_2, window_bounds = array<i64: 1, 128>}, {transform_indices = @transform_3, window_bounds = array<i64: 128, 128>}, {pipeline_mode = #tpu.pipeline_mode<synchronous>, transform_indices = @transform_4, window_bounds = array<i64: 1, 128>}, {transform_indices = @transform_5, window_bounds = array<i64: 64, 128>}]} {
    %c0_i32 = arith.constant 0 : i32
    %0 = arith.cmpi eq, %arg1, %c0_i32 : i32
    %1 = arith.extui %0 : i1 to i32
    %c0_i32_0 = arith.constant 0 : i32
    %2 = arith.cmpi ne, %1, %c0_i32_0 : i32
    scf.if %2 {
      %cst_15 = arith.constant 0.000000e+00 : f32
      %21 = vector.broadcast %cst_15 : f32 to vector<64x128xf32>
      %c0_16 = arith.constant 0 : index
      %c0_17 = arith.constant 0 : index
      %22 = vector.load %arg8[%c0_16, %c0_17] : memref<64x128xf32, #tpu.memory_space<vmem>>, vector<64x128xf32>
      tpu.vector_store %arg8[%c0_16, %c0_17], %21 {strides = array<i32>} : memref<64x128xf32, #tpu.memory_space<vmem>>, vector<64x128xf32>,
    } else {
    }
    %c0 = arith.constant 0 : index
    %c0_1 = arith.constant 0 : index
    %3 = vector.load %arg2[%c0, %c0_1] : memref<64x128xf32, #tpu.memory_space<vmem>>, vector<64x128xf32>
    %4 = arith.truncf %3 : vector<64x128xf32> to vector<64x128xbf16>
    %c0_2 = arith.constant 0 : index
    %c0_3 = arith.constant 0 : index
    %5 = vector.load %arg3[%c0_2, %c0_3] : memref<128x128xbf16, #tpu.memory_space<vmem>>, vector<128x128xbf16>
    %cst = arith.constant dense<0.000000e+00> : vector<64x128xf32>
    %6 = tpu.matmul %4, %5, %cst {dimension_numbers = #tpu.dot_dimension_numbers<[1], [0], [0], [1], [0, 0, 1, 1], [], []>} : vector<64x128xbf16>, vector<128x128xbf16>, vector<64x128xf32> -> vector<64x128xf32>
    %c0_4 = arith.constant 0 : index
    %c0_5 = arith.constant 0 : index
    %7 = vector.load %arg4[%c0_4, %c0_5] : memref<1x128xf32, #tpu.memory_space<vmem>>, vector<1x128xf32>
    %8 = vector.broadcast %7 : vector<1x128xf32> to vector<64x128xf32>
    %9 = arith.addf %6, %8 : vector<64x128xf32>
    %cst_6 = arith.constant 0.000000e+00 : f32
    %10 = vector.broadcast %cst_6 : f32 to vector<64x128xf32>
    %11 = arith.maximumf %9, %10 : vector<64x128xf32>
    %c0_7 = arith.constant 0 : index
    %c0_8 = arith.constant 0 : index
    %12 = vector.load %arg8[%c0_7, %c0_8] : memref<64x128xf32, #tpu.memory_space<vmem>>, vector<64x128xf32>
    %13 = arith.truncf %11 : vector<64x128xf32> to vector<64x128xbf16>
    %c0_9 = arith.constant 0 : index
    %c0_10 = arith.constant 0 : index
    %14 = vector.load %arg5[%c0_9, %c0_10] : memref<128x128xbf16, #tpu.memory_space<vmem>>, vector<128x128xbf16>
    %cst_11 = arith.constant dense<0.000000e+00> : vector<64x128xf32>
    %15 = tpu.matmul %13, %14, %cst_11 {dimension_numbers = #tpu.dot_dimension_numbers<[1], [0], [0], [1], [0, 0, 1, 1], [], []>} : vector<64x128xbf16>, vector<128x128xbf16>, vector<64x128xf32> -> vector<64x128xf32>
    %16 = arith.addf %12, %15 : vector<64x128xf32>
    %c0_12 = arith.constant 0 : index
    %c0_13 = arith.constant 0 : index
    %17 = vector.load %arg8[%c0_12, %c0_13] : memref<64x128xf32, #tpu.memory_space<vmem>>, vector<64x128xf32>
    tpu.vector_store %arg8[%c0_12, %c0_13], %16 {strides = array<i32>} : memref<64x128xf32, #tpu.memory_space<vmem>>, vector<64x128xf32>,
    %c1_i32 = arith.constant 1 : i32
    %18 = arith.cmpi eq, %arg1, %c1_i32 : i32
    %19 = arith.extui %18 : i1 to i32
    %c0_i32_14 = arith.constant 0 : i32
    %20 = arith.cmpi ne, %19, %c0_i32_14 : i32
    scf.if %20 {
      %c0_15 = arith.constant 0 : index
      %c0_16 = arith.constant 0 : index
      %21 = vector.load %arg8[%c0_15, %c0_16] : memref<64x128xf32, #tpu.memory_space<vmem>>, vector<64x128xf32>
      %c0_17 = arith.constant 0 : index
      %c0_18 = arith.constant 0 : index
      %22 = vector.load %arg6[%c0_17, %c0_18] : memref<1x128xf32, #tpu.memory_space<vmem>>, vector<1x128xf32>
      %23 = vector.broadcast %22 : vector<1x128xf32> to vector<64x128xf32>
      %24 = arith.addf %21, %23 : vector<64x128xf32>
      %c0_19 = arith.constant 0 : index
      %c0_20 = arith.constant 0 : index
      %25 = vector.load %arg7[%c0_19, %c0_20] : memref<64x128xf32, #tpu.memory_space<vmem>>, vector<64x128xf32>
      tpu.vector_store %arg7[%c0_19, %c0_20], %24 {strides = array<i32>} : memref<64x128xf32, #tpu.memory_space<vmem>>, vector<64x128xf32>,
    } else {
    }
    return
  }
  func.func @transform_0(%arg0: i32, %arg1: i32) -> (i32, i32) {
    %c0_i32 = arith.constant 0 : i32
    %c0_i32_0 = arith.constant 0 : i32
    return %arg0, %c0_i32 : i32, i32
  }
  func.func @transform_1(%arg0: i32, %arg1: i32) -> (i32, i32) {
    %c0_i32 = arith.constant 0 : i32
    %c0_i32_0 = arith.constant 0 : i32
    return %c0_i32, %arg1 : i32, i32
  }
  func.func @transform_2(%arg0: i32, %arg1: i32) -> (i32, i32) {
    %c0_i32 = arith.constant 0 : i32
    %c0_i32_0 = arith.constant 0 : i32
    return %c0_i32, %arg1 : i32, i32
  }
  func.func @transform_3(%arg0: i32, %arg1: i32) -> (i32, i32) {
    %c0_i32 = arith.constant 0 : i32
    %c0_i32_0 = arith.constant 0 : i32
    return %arg1, %c0_i32 : i32, i32
  }
  func.func @transform_4(%arg0: i32, %arg1: i32) -> (i32, i32) {
    %c0_i32 = arith.constant 0 : i32
    %c0_i32_0 = arith.constant 0 : i32
    %c0_i32_1 = arith.constant 0 : i32
    return %c0_i32, %c0_i32_0 : i32, i32
  }
  func.func @transform_5(%arg0: i32, %arg1: i32) -> (i32, i32) {
    %c0_i32 = arith.constant 0 : i32
    %c0_i32_0 = arith.constant 0 : i32
    return %arg0, %c0_i32 : i32, i32
  }
}

</mosaic_0001>

<bundles_post_ra>
// kernel: tpu_custom_call.1
= control target key start
LH: loop header
LB: loop body
LE: loop exit
PB: predicated region body
PF: predicated region fallthrough
CT: control target
= control target key end

     0   :  { %s1793_s0 = inlined_call_operand.hbm [shape: f32[256,128], index: 0, kind: input, shape index: {}]   ;;  %s1794_s1 = inlined_call_operand.hbm [shape: bf16[128,256], index: 1, kind: input, shape index: {}]   ;;  %s1795_s2 = inlined_call_operand.vmem [shape: f32[1,256], index: 2, kind: input, shape index: {}]   ;;  %s1796_s3 = inlined_call_operand.hbm [shape: bf16[256,128], index: 3, kind: input, shape index: {}]   ;;  %s1797_s4 = inlined_call_operand.vmem [shape: f32[1,128], index: 4, kind: input, shape index: {}]   ;;  %s1798_s5 = inlined_call_operand.hbm [shape: f32[256,128], index: 5, kind: output, shape index: {}]  }
   0x1   :  { %1814 = sst [smem:[#allocation21_spill]] %s1794_s1 }
   0x2   :  { %1815 = sst [smem:[#allocation22_spill]] %s1797_s4 }
   0x3   :  { %1816 = sst [smem:[#allocation23_spill]] %s1798_s5 }
   0x4   :  { %10 = vsyncpa [#allocation4], 0 }
   0x5   :  { %12 = vsyncpa [#allocation4 + $0x1], 0 }
   0x6   :  { %13 = vsyncpa [#allocation7], 0 }
   0x7   :  { %15 = vsyncpa [#allocation7 + $0x1], 0 }
   0x8   :  { %16 = vsyncpa [#allocation5], 0 }
   0x9   :  { %18 = vsyncpa [#allocation5 + $0x1], 0  ;;  %s1370_s18 = smov 0   ;;  %s1372_s19 = smov 0  }
   0xa   :  { %s1374_s20 = smov 0   ;;  %s1376_s21 = smov 0  }
   0xb   :  { %s1378_s22 = smov 0   ;;  %s1380_s23 = smov 0  }
   0xc   :  { %s1382_s24 = smov 0   ;;  %s1384_s25 = smov 0  }
   0xd   :  { %s1386_s26 = smov 0   ;;  %s1388_s27 = smov 0  }
   0xe   :  { %s1390_s28 = smov 0  }
   0xf LB: > { %1817 = sst [smem:[#allocation13_spill]] %s1295_s20  ;;  %s33_s29 = sadd.s32 1, %s1319_s26  ;;  %s1327_s28 = sphi %s1390_s28, %s24_s28   ;;  %s1323_s27 = sphi %s1388_s27, %s1859_s27   ;;  %s1319_s26 = sphi %s1386_s26, %s1865_s26   ;;  %s1315_s25 = sphi %s1384_s25, %s1857_s25   ;;  %s1311_s24 = sphi %s1382_s24, %s1864_s24   ;;  %s1307_s23 = sphi %s1380_s23, %s1856_s23   ;;  %s1303_s22 = sphi %s1378_s22, %s1863_s22   ;;  %s1299_s21 = sphi %s1376_s21, %s1862_s21   ;;  %s1295_s20 = sphi %s1374_s20, %s1854_s20   ;;  %s1291_s19 = sphi %s1372_s19, %s1861_s19   ;;  %s1287_s18 = sphi %s1370_s18, %s1860_s18  }
  0x10   : > { %1818 = sst [smem:[#allocation14_spill]] %s1307_s23  ;;  %p1801_p0 = scmp.eq.s32.totalorder %s1327_s28, 0 }
  0x11   : > { %1819 = sst [smem:[#allocation15_spill]] %s1315_s25  ;;  %p1427_p1 = scmp.ge.s32.totalorder %s33_s29, 2 }
  0x12   : > { %1820 = sst [smem:[#allocation16_spill]] %s1323_s27  ;;  %s69_s6 = sadd.s32 1, %s1295_s20 }
  0x13   : > { %p76_p2 = scmp.ne.s32.totalorder %s1295_s20, %s1291_s19  ;;  %s1867_s29 = smov (%p1427_p1, %s33_s29), 0 }
  0x14   : > { %1822 = sst [smem:[#allocation17_spill]] %s1867_s29  ;;  %s66_s8 = ssub.s32 %s1319_s26, %s1867_s29 }
  0x15   : > { %p1442_p4 = por %p76_p2, %p1801_p0  ;;  %p1800_p5 = scmp.lt.s32.totalorder %s1327_s28, 8 }
  0x16   : > { %p67_p6 = scmp.eq.s32.totalorder %s66_s8, 0  ;;  %s229_s9 = sand.u32 1, %s1327_s28  }
  0x17   : > { %s231_s10 = sand.u32 1, %s1295_s20   ;;  %s867_s13 = sshll.u32 %s1319_s26, 6 }
  0x18   : > { %s1452_s11 = scalar_select %p67_p6, %s1295_s20, %s69_s6  }
  0x19   : > { %s1454_s12 = sshll.u32 %s231_s10, 6  ;;  %s1825_s1 = sld [smem:[#allocation21_spill]] }
  0x1a   : > { %1824 = sst [smem:[#allocation18_spill]] %s1452_s11  ;;  %s233_s17 = scalar_lea.vmem [#allocation6], %s1454_s12 }
  0x1b   : > { %s239_s29 = sshll.u32 %s233_s17, 4  ;;  %p1469_p7 = pnand %p1800_p5, %p1442_p4  ;;  %s1463_s29 = int_to_ptr.vmem [resolvable:$true] %s239_s29 }
  0x1c   : > { %s1474_s8 = scalar_lea.sflag [#allocation7], %s229_s9 }
  0x1d   : > { %p1804_p10 = pneg %p1469_p7 }
  0x1f   : > { %s1460_s16 = scalar_lea.hbm %s1825_s1, %s867_s13  ;;  %s1116_s14 = scalar_lea.hbm %s1825_s1, 2048 }
  0x20   : > { %s1111_s10 = scalar_lea.hbm %s1460_s16, 1024  ;;  %p1117_p13 = scmp.lt.u32.totalorder %s1460_s16, %s1825_s1 }
  0x21   : > { %p1112_p9 = scmp.ne.s32.totalorder %s1460_s16, %s1111_s10  ;;  %p1118_p2 = scmp.lt.u32.totalorder %s1116_s14, %s1111_s10 }
  0x22   : > { %p1120_p6 = scmp.lt.u32.totalorder %s1111_s10, %s1460_s16 }
  0x23   : > { %p1114_p11 = pnand %p1804_p10, %p1112_p9  ;;  %p1119_p4 = por %p1118_p2, %p1117_p13 }
  0x25   : > { %p1115_p12 = pneg %p1114_p11  ;;  %p1121_p5 = por %p1120_p6, %p1119_p4 }
  0x27   : > { %p1122_p3 = pnand %p1121_p5, %p1115_p12 }
  0x29   : > { %1125 = shalt.err (!%p1122_p3)
}
  0x2a   : > { %s1126_s9 = scalar_lea.vmem %s1463_s29, 1024  ;;  %s1329_s13 = smov [#allocation6]  }
  0x2b   : > { %p1127_p9 = scmp.ne.s32.totalorder %s1463_s29, %s1126_s9  ;;  %s1131_s7 = sshll.u32 %s1329_s13, 4  ;;  %s1132_s7 = int_to_ptr.vmem [resolvable:$false] %s1131_s7 }
  0x2c   : > { %s1133_s15 = scalar_lea.vmem %s1132_s7, 2048  ;;  %p1134_p8 = scmp.lt.s32.totalorder %s1463_s29, %s1132_s7 }
  0x2d   : > { %p1129_p11 = pnand %p1127_p9, %p1804_p10  ;;  %p1135_p13 = scmp.lt.s32.totalorder %s1133_s15, %s1126_s9 }
  0x2f   : > { %p1130_p0 = pneg %p1129_p11  ;;  %p1136_p2 = por %p1135_p13, %p1134_p8 }
  0x31   : > { %p1137_p4 = pnand %p1136_p2, %p1130_p0 }
  0x33   : > { %1140 = shalt.err (!%p1137_p4)
}
  0x34   : > { %s1805_s10 = smov 128   ;;  %s1802_s14 = smov 64  }
  0x35   : > { %s1803_s17 = smov 4   ;;  %p274_p0 = scmp.lt.s32.totalorder %s1327_s28, 9 }
  0x36   : > { %990 = dma.hbm_to_vmem [thread:$0]  (!%p1469_p7), %s1460_s16, 1024, %s1463_s29, %s1474_s8, %s1805_s10, %s1802_s14, %s1803_s17  }
  0x37   : > { %p1827_p3 = scmp.ge.s32.totalorder %s1327_s28, 1  ;;  %s1513_s13 = sadd.s32 4294967295, %s1327_s28  }
  0x38   : > { %s860_s7 = sadd.s32 4294967294, %s1327_s28   ;;  %s36_s15 = sadd.s32 1, %s1323_s27 }
  0x39   : > { %p1508_p5 = pnand %p1827_p3, %p274_p0  ;;  %s43_s1 = sadd.s32 1, %s1307_s23 }
  0x3a   : > { %s1869_s15 = smov (!%p1427_p1, %s36_s15), %s1323_s27  ;;  %p50_p8 = scmp.ne.s32.totalorder %s1307_s23, %s1303_s22 }
  0x3b   : > { %s1828_s9 = scalar_select %p1508_p5, 1, 0 }
  0x3c   : > { %p56_p12 = scmp.ne.s32.totalorder %s1303_s22, %s1299_s21  ;;  %p38_p6 = scmp.ge.s32.totalorder %s1869_s15, 4 }
  0x3d   : > { %p57_p9 = scmp.eq.s32.totalorder %s1513_s13, 0  ;;  %p1829_p11 = scmp.eq.s32.totalorder %s1327_s28, 0 }
  0x3e   : > { %p179_p2 = scmp.eq.s32.totalorder %s1513_s13, 7  ;;  %s1871_s15 = smov (%p38_p6, %s1869_s15), 0 }
  0x3f   : > { %p1528_p13 = por %p1829_p11, %p50_p8  ;;  %1831 = sst [smem:[#allocation19_spill]] %s1871_s15 }
  0x40   : > { %p1538_p1 = por %p57_p9, %p56_p12  ;;  %p1833_p4 = scmp.ne.s32.totalorder %s1291_s19, %s1287_s18 }
  0x41   : > { %s40_s14 = ssub.s32 %s1323_s27, %s1871_s15  ;;  %p1551_p3 = por %p179_p2, %p50_p8 }
  0x42   : > { %s1832_s30 = scalar_select %p1538_p1, 1, 0 }
  0x43   : > { %p1545_p0 = por %p1833_p4, %p57_p9  ;;  %p41_p11 = scmp.eq.s32.totalorder %s40_s14, 0 }
  0x44   : > { %s1835_s17 = scalar_select %p1551_p3, 1, 0 }
  0x45   : > { %s1834_s16 = scalar_select %p1545_p0, 1, 0 }
  0x46   : > { %p185_p10 = scmp.eq.s32.totalorder %s860_s7, 7  ;;  %s208_s10 = sand.u32 1, %s1307_s23  }
  0x47   : > { %s901_s11 = sshll.u32 %s1323_s27, 10  ;;  %s863_s18 = sshll.u32 %s208_s10, 6 }
  0x48   : > { %s1558_s20 = scalar_select %p41_p11, %s1307_s23, %s43_s1  }
  0x49   : > { %p1563_p6 = por %p185_p10, %p56_p12  ;;  %s1570_s15 = scalar_lea.hbm %s1793_s0, %s901_s11 }
  0x4a   : > { %1836 = sst [smem:[#allocation20_spill]] %s1558_s20  ;;  %p1838_p8 = scmp.lt.s32.totalorder %s1327_s28, 8 }
  0x4b   : > { %s1837_s5 = scalar_select %p1563_p6, 1, 0 }
  0x4c   : > { %p1576_p9 = pnand %p1838_p8, %p1528_p13  ;;  %s212_s14 = scalar_lea.vmem [#allocation3], %s863_s18 }
  0x4d   : > { %s219_s7 = sshll.u32 %s212_s14, 4  ;;  %s1582_s27 = scalar_lea.sflag [#allocation4], %s208_s10  ;;  %s1580_s7 = int_to_ptr.vmem [resolvable:$true] %s219_s7 }
  0x4e   : > { %s1141_s4 = scalar_lea.hbm %s1570_s15, 1024  ;;  %p1143_p12 = pneg %p1576_p9 }
  0x4f   : > { %p1142_p10 = scmp.ne.s32.totalorder %s1570_s15, %s1141_s4  ;;  %s1146_s29 = scalar_lea.hbm %s1793_s0, 4096 }
  0x50   : > { %p1147_p13 = scmp.lt.u32.totalorder %s1570_s15, %s1793_s0  ;;  %p1148_p11 = scmp.lt.u32.totalorder %s1146_s29, %s1141_s4 }
  0x51   : > { %p1144_p2 = pnand %p1143_p12, %p1142_p10  ;;  %p1150_p6 = scmp.lt.u32.totalorder %s1141_s4, %s1570_s15 }
  0x52   : > { %p1149_p8 = por %p1148_p11, %p1147_p13 }
  0x53   : > { %p1145_p4 = pneg %p1144_p2 }
  0x54   : > { %p1151_p3 = por %p1150_p6, %p1149_p8 }
  0x56   : > { %p1152_p0 = pnand %p1151_p3, %p1145_p4 }
  0x58   : > { %1155 = shalt.err (!%p1152_p0)
}
  0x59   : > { %s1156_s10 = scalar_lea.vmem %s1580_s7, 1024  ;;  %s1333_s18 = smov [#allocation3]  }
  0x5a   : > { %p1157_p10 = scmp.ne.s32.totalorder %s1580_s7, %s1156_s10  ;;  %s1161_s14 = sshll.u32 %s1333_s18, 4  ;;  %s1162_s14 = int_to_ptr.vmem [resolvable:$false] %s1161_s14 }
  0x5b   : > { %s1163_s20 = scalar_lea.vmem %s1162_s14, 2048  ;;  %p1164_p5 = scmp.lt.s32.totalorder %s1580_s7, %s1162_s14 }
  0x5c   : > { %p1159_p2 = pnand %p1157_p10, %p1143_p12  ;;  %p1165_p13 = scmp.lt.s32.totalorder %s1163_s20, %s1156_s10 }
  0x5e   : > { %p1160_p1 = pneg %p1159_p2  ;;  %p1166_p11 = por %p1165_p13, %p1164_p5 }
  0x60   : > { %p1167_p6 = pnand %p1166_p11, %p1160_p1 }
  0x62   : > { %1170 = shalt.err (!%p1167_p6)
}
  0x63   : > { %s1334_s23 = smov 8   ;;  %s1840_s4 = smov 128  }
  0x64   : > { %987 = dma.hbm_to_vmem [thread:$0]  (!%p1576_p9), %s1570_s15, 1024, %s1580_s7, %s1582_s27, %s1840_s4, %s1840_s4, %s1334_s23  }
  0x65   : > { %s902_s25 = sshll.u32 %s1319_s26, 10  ;;  %s259_s1 = scalar_lea.vmem [#allocation8], %s1454_s12 }
  0x66   : > { %s1616_s10 = scalar_lea.hbm %s1796_s3, %s902_s25  ;;  %s266_s18 = sshll.u32 %s259_s1, 4  ;;  %s1619_s18 = int_to_ptr.vmem [resolvable:$true] %s266_s18 }
  0x67   : > { %s1171_s14 = scalar_lea.hbm %s1616_s10, 1024  ;;  %p1841_p1 = pneg %p1469_p7 }
  0x68   : > { %p1172_p5 = scmp.ne.s32.totalorder %s1616_s10, %s1171_s14  ;;  %s1176_s7 = scalar_lea.hbm %s1796_s3, 2048 }
  0x69   : > { %p1177_p9 = scmp.lt.u32.totalorder %s1616_s10, %s1796_s3  ;;  %p1178_p12 = scmp.lt.u32.totalorder %s1176_s7, %s1171_s14 }
  0x6a   : > { %p1174_p0 = pnand %p1172_p5, %p1841_p1  ;;  %p1180_p8 = scmp.lt.u32.totalorder %s1171_s14, %s1616_s10 }
  0x6b   : > { %p1179_p4 = por %p1178_p12, %p1177_p9 }
  0x6c   : > { %p1175_p3 = pneg %p1174_p0 }
  0x6d   : > { %p1181_p10 = por %p1180_p8, %p1179_p4 }
  0x6f   : > { %p1182_p2 = pnand %p1181_p10, %p1175_p3 }
  0x71   : > { %1185 = shalt.err (!%p1182_p2)
}
  0x72   : > { %s1186_s12 = scalar_lea.vmem %s1619_s18, 1024  ;;  %p1842_p11 = pmov %p1841_p1 }
  0x73   : > { %p1187_p13 = scmp.ne.s32.totalorder %s1619_s18, %s1186_s12  ;;  %s1335_s4 = smov [#allocation8]  }
  0x74   : > { %s1191_s25 = sshll.u32 %s1335_s4, 4  ;;  %s1192_s25 = int_to_ptr.vmem [resolvable:$false] %s1191_s25 }
  0x75   : > { %p1189_p6 = pnand %p1187_p13, %p1842_p11  ;;  %s1193_s11 = scalar_lea.vmem %s1192_s25, 2048 }
  0x76   : > { %p1194_p1 = scmp.lt.s32.totalorder %s1619_s18, %s1192_s25  ;;  %p1195_p0 = scmp.lt.s32.totalorder %s1193_s11, %s1186_s12 }
  0x77   : > { %p1190_p5 = pneg %p1189_p6 }
  0x78   : > { %p1196_p9 = por %p1195_p0, %p1194_p1 }
  0x7a   : > { %p1197_p12 = pnand %p1196_p9, %p1190_p5 }
  0x7c   : > { %1200 = shalt.err (!%p1197_p12)
}
  0x7d   : > { %s1843_s29 = smov 4   ;;  %s1844_s1 = smov 64  }
  0x7e   : > { %993 = dma.hbm_to_vmem [thread:$0]  (!%p1469_p7), %s1616_s10, 1024, %s1619_s18, %s1474_s8, %s1844_s1, %s1844_s1, %s1843_s29  }
  0x7f   : > { %p1845_p3 = scmp.ne.s32.totalorder %s1828_s9, 0 }
  0x80   : > { %s1651_s14 = sand.u32 (!%p1845_p3), 1, %s1303_s22   ;;  %p1846_p4 = scmp.ne.s32.totalorder (!%p1845_p3), %s1832_s30, 0 }
  0x81   : > { %278 = sbr.rel (%p1845_p3) target bundleno = 671 (0x29f), region = 40  ;;  %s872_s27 = sshll.u32 (!%p1845_p3), %s1651_s14, 6 }
  0x82   : > { %s281_s15 = scalar_lea.sflag (!%p1845_p3), [#allocation4], %s1651_s14  ;;  %s1655_s7 = scalar_lea.vmem (!%p1845_p3), [#allocation3], %s872_s27 }
  0x88   : > { %1274 = dma.done.wait (%p1846_p4), %s281_s15, 1024  }
  0x89   : > { %1276 = vsyncadd (%p1846_p4), %s281_s15, 4294966272  ;;  %s289_s6 = sand.u32 1, %s1513_s13   ;;  %s291_s8 = sand.u32 1, %s1291_s19  }
  0x8a   : > { %s873_s9 = sshll.u32 %s291_s8, 6  ;;  %s290_s10 = scalar_lea.sflag [#allocation7], %s289_s6 }
  0x8b   : > { %s1663_s18 = scalar_lea.vmem [#allocation6], %s873_s9  ;;  %p1847_p7 = scmp.ne.s32.totalorder %s1834_s16, 0 }
  0x8d   : > { %1278 = dma.done.wait (%p1847_p7), %s290_s10, 2048  }
  0x8e   : > { %1280 = vsyncadd (%p1847_p7), %s290_s10, 4294965248  ;;  %p343_p8 = scmp.lt.s32.totalorder %s1311_s24, 1  ;;  %s1677_s12 = scalar_lea.vmem [#allocation8], %s873_s9 }
  0x8f   : > { %s1679_s4 = scalar_lea.vmem [#allocation9], %s872_s27  ;;  %p876_p10 = scmp.ne.s32.totalorder %s1311_s24, 0 }
  0x90   : > { %s1671_s20 = scalar_select %p343_p8, %s1311_s24, 1 }
  0x91   : > { %352 = sbr.rel (%p876_p10) target bundleno = 152 (0x98), region = 56  ;;  %v1336_v0 = vmov (!%p876_p10), 0.0  }
  0x92   : > { %s345_s13 = scalar_lea.vmem %s1795_s2, %s1671_s20  ;;  %353 = vst [vmem:[#allocation2] sm:$0xff] (!%p876_p10), %v1336_v0  ;;  %354 = vst [vmem:[#allocation2 + $0x8] sm:$0xff] (!%p876_p10), %v1336_v0 }
  0x93   : > { %355 = vst [vmem:[#allocation2 + $0x10] sm:$0xff] (!%p876_p10), %v1336_v0  ;;  %356 = vst [vmem:[#allocation2 + $0x18] sm:$0xff] (!%p876_p10), %v1336_v0 }
  0x94   : > { %357 = vst [vmem:[#allocation2 + $0x20] sm:$0xff] (!%p876_p10), %v1336_v0  ;;  %358 = vst [vmem:[#allocation2 + $0x28] sm:$0xff] (!%p876_p10), %v1336_v0 }
  0x95   : > { %359 = vst [vmem:[#allocation2 + $0x30] sm:$0xff] (!%p876_p10), %v1336_v0  ;;  %360 = vst [vmem:[#allocation2 + $0x38] sm:$0xff] (!%p876_p10), %v1336_v0 }
  0x98 PF: > { %v1095_v1 = vld [vmem:[%s1663_s18] sm:$0xff]   ;;  %v1096_v2 = vld [vmem:[%s1663_s18 + $0x8] sm:$0xff]   ;;  %v1097_v3 = vld [vmem:[%s1663_s18 + $0x10] sm:$0xff]   ;;  %p894_p2 = scmp.ne.s32.totalorder %s1311_s24, 1 }
  0x99   : > { %928 = vmatprep.subr.bf16.mxu0 %v1095_v1  ;;  %v1098_v4 = vld [vmem:[%s1663_s18 + $0x18] sm:$0xff]   ;;  %v361_v5 = vld [vmem:[%s1655_s7] sm:$0xff]  ;;  %v362_v6 = vld [vmem:[%s1655_s7 + $0x8] sm:$0xff]  ;;  %s1848_s1 = sld [smem:[#allocation22_spill]] (!%p894_p2) }
  0x9a   : > { %929 = vmatpush3.bf16.msra.mxu0 %v1095_v1  ;;  %v369_v7 = vpack.c.bf16 %v362_v6, %v361_v5  ;;  %v1099_v8 = vld [vmem:[%s1663_s18 + $0x20] sm:$0xff]   ;;  %v1104_v10 = vld [vmem:[%s1677_s12 + $0x8] sm:$0xff]   ;;  %v1105_v11 = vld [vmem:[%s1677_s12 + $0x10] sm:$0xff]  }
  0x9b   : > { %930 = vmatprep.subr.bf16.mxu0 %v1096_v2  ;;  %v1103_v9 = vld [vmem:[%s1677_s12] sm:$0xff]   ;;  %v1100_v12 = vld [vmem:[%s1663_s18 + $0x28] sm:$0xff]   ;;  %v1106_v13 = vld [vmem:[%s1677_s12 + $0x18] sm:$0xff]  }
  0x9c   : > { %944 = vmatprep.mubr.bf16.mxu0 %v369_v7  ;;  %952 = vmatprep.subr.bf16.mxu1 %v1103_v9  ;;  %v1101_v14 = vld [vmem:[%s1663_s18 + $0x30] sm:$0xff]   ;;  %v1107_v15 = vld [vmem:[%s1677_s12 + $0x20] sm:$0xff]   ;;  %v1102_v16 = vld [vmem:[%s1663_s18 + $0x38] sm:$0xff]  }
  0x9d   : > { %953 = vmatpush3.bf16.msra.mxu1 %v1103_v9  ;;  %v363_v17 = vld [vmem:[%s1655_s7 + $0x10] sm:$0xff]  ;;  %v364_v18 = vld [vmem:[%s1655_s7 + $0x18] sm:$0xff]  ;;  %v1108_v19 = vld [vmem:[%s1677_s12 + $0x28] sm:$0xff]  }
  0x9e   : > { %931 = vmatpush3.bf16.msra.mxu0 %v1096_v2  ;;  %954 = vmatprep.subr.bf16.mxu1 %v1104_v10  ;;  %v365_v20 = vld [vmem:[%s1655_s7 + $0x20] sm:$0xff]  ;;  %v366_v21 = vld [vmem:[%s1655_s7 + $0x28] sm:$0xff]  ;;  %v370_v22 = vpack.c.bf16 %v364_v18, %v363_v17  ;;  %v367_v24 = vld [vmem:[%s1655_s7 + $0x30] sm:$0xff] }
  0x9f   : > { %932 = vmatprep.subr.bf16.mxu0 %v1097_v3  ;;  %v371_v23 = vpack.c.bf16 %v366_v21, %v365_v20  ;;  %v368_v25 = vld [vmem:[%s1655_s7 + $0x38] sm:$0xff]  ;;  %v1109_v27 = vld [vmem:[%s1677_s12 + $0x30] sm:$0xff]   ;;  %v877_v29 = vld [vmem:[%s345_s13] ss:$0 sm:$0xff] }
  0xa0   : > { %v372_v26 = vpack.c.bf16 %v368_v25, %v367_v24  ;;  %v1110_v28 = vld [vmem:[%s1677_s12 + $0x38] sm:$0xff]   ;;  %v519_v58 = vld [vmem:[#allocation2 + $0x10] sm:$0xff]  ;;  %v517_v59 = vld [vmem:[#allocation2] sm:$0xff] }
  0xa1   : > { %955 = vmatpush3.bf16.msra.mxu1 %v1104_v10  ;;  %v520_v61 = vld [vmem:[#allocation2 + $0x18] sm:$0xff]  ;;  %v518_v0 = vld [vmem:[#allocation2 + $0x8] sm:$0xff]  ;;  %v523_v6 = vld [vmem:[#allocation2 + $0x30] sm:$0xff] }
  0xa2   : > { %933 = vmatpush3.bf16.msra.mxu0 %v1097_v3  ;;  %956 = vmatprep.subr.bf16.mxu1 %v1105_v11  ;;  %v521_v7 = vld [vmem:[#allocation2 + $0x20] sm:$0xff]  ;;  %v524_v9 = vld [vmem:[#allocation2 + $0x38] sm:$0xff] }
  0xa3   : > { %934 = vmatprep.subr.bf16.mxu0 %v1098_v4 }
  0xa5   : > { %957 = vmatpush3.bf16.msra.mxu1 %v1105_v11 }
  0xa6   : > { %935 = vmatpush3.bf16.msra.mxu0 %v1098_v4  ;;  %958 = vmatprep.subr.bf16.mxu1 %v1106_v13 }
  0xa7   : > { %936 = vmatprep.subr.bf16.mxu0 %v1099_v8 }
  0xa9   : > { %959 = vmatpush3.bf16.msra.mxu1 %v1106_v13 }
  0xaa   : > { %937 = vmatpush3.bf16.msra.mxu0 %v1099_v8  ;;  %960 = vmatprep.subr.bf16.mxu1 %v1107_v15 }
  0xab   : > { %938 = vmatprep.subr.bf16.mxu0 %v1100_v12 }
  0xad   : > { %961 = vmatpush3.bf16.msra.mxu1 %v1107_v15 }
  0xae   : > { %939 = vmatpush3.bf16.msra.mxu0 %v1100_v12  ;;  %962 = vmatprep.subr.bf16.mxu1 %v1108_v19  ;;  %v522_v12 = vld [vmem:[#allocation2 + $0x28] sm:$0xff] }
  0xaf   : > { %940 = vmatprep.subr.bf16.mxu0 %v1101_v14 }
  0xb1   : > { %963 = vmatpush3.bf16.msra.mxu1 %v1108_v19  ;;  %v895_v19 = vld [vmem:[%s1848_s1] ss:$0 sm:$0xff] (!%p894_p2) }
  0xb2   : > { %941 = vmatpush3.bf16.msra.mxu0 %v1101_v14  ;;  %964 = vmatprep.subr.bf16.mxu1 %v1109_v27 }
  0xb3   : > { %942 = vmatprep.subr.bf16.mxu0 %v1102_v16 }
  0xb5   : > { %965 = vmatpush3.bf16.msra.mxu1 %v1109_v27 }
  0xb6   : > { %943 = vmatpush3.bf16.msra.mxu0 %v1102_v16  ;;  %966 = vmatprep.subr.bf16.mxu1 %v1110_v28 }
  0xb9   : > { %945 = vmatmul.mubr.bf16.vlgmr.msra.gmra.mrb[0].mxu0 %v370_v22  ;;  %967 = vmatpush3.bf16.msra.mxu1 %v1110_v28 }
  0xba   : > { %948 = vmatprep.mubr.bf16.mxu0 %v371_v23 }
  0xc1   : > { %949 = vmatmul.mubr.bf16.gmra.mrb[4].mxu0 %v372_v26 }
 0x18c   : > { %v946_v30 = vpop.f32.mrb[0].mxu0 }
 0x18d   : > { %v487_v31 = vadd.f32 %v946_v30, %v877_v29  ;;  %v478_v32 = vpop.f32.mrb[1].mxu0 }
 0x18e   : > { %v479_v33 = vadd.f32 %v877_v29, %v478_v32  ;;  %v947_v34 = vpop.f32.mrb[2].mxu0 }
 0x18f   : > { %v490_v35 = vadd.f32 %v947_v34, %v877_v29  ;;  %v481_v36 = vpop.f32.mrb[3].mxu0  ;;  %v511_v38 = vmax.f32 %v487_v31, 0.0 }
 0x190   : > { %v482_v37 = vadd.f32 %v877_v29, %v481_v36  ;;  %v509_v40 = vmax.f32 %v479_v33, 0.0 }
 0x191   : > { %v512_v39 = vmax.f32 %v490_v35, 0.0 }
 0x192   : > { %v510_v41 = vmax.f32 %v482_v37, 0.0 }
 0x193   : > { %v526_v42 = vpack.c.bf16 %v512_v39, %v511_v38 }
 0x194   : > { %v950_v43 = vpop.f32.mrb[4].mxu0  ;;  %v525_v44 = vpack.c.bf16 %v510_v41, %v509_v40 }
 0x195   : > { %v503_v45 = vadd.f32 %v950_v43, %v877_v29  ;;  %v494_v46 = vpop.f32.mrb[5].mxu0 }
 0x196   : > { %v495_v47 = vadd.f32 %v877_v29, %v494_v46  ;;  %v951_v48 = vpop.f32.mrb[6].mxu0  ;;  %968 = vmatprep.mubr.bf16.mxu1 %v525_v44 }
 0x197   : > { %v506_v49 = vadd.f32 %v951_v48, %v877_v29  ;;  %v497_v50 = vpop.f32.mrb[7].mxu0  ;;  %969 = vmatmul.mubr.bf16.vlgmr.msra.gmra.mrb[0].mxu1 %v526_v42  ;;  %v515_v52 = vmax.f32 %v503_v45, 0.0 }
 0x198   : > { %v498_v51 = vadd.f32 %v877_v29, %v497_v50  ;;  %v513_v54 = vmax.f32 %v495_v47, 0.0 }
 0x199   : > { %v516_v53 = vmax.f32 %v506_v49, 0.0 }
 0x19a   : > { %v514_v55 = vmax.f32 %v498_v51, 0.0 }
 0x19b   : > { %v528_v56 = vpack.c.bf16 %v516_v53, %v515_v52 }
 0x19c   : > { %v527_v57 = vpack.c.bf16 %v514_v55, %v513_v54 }
 0x19e   : > { %972 = vmatprep.mubr.bf16.mxu1 %v527_v57 }
 0x19f   : > { %973 = vmatmul.mubr.bf16.gmra.mrb[4].mxu1 %v528_v56 }
 0x26a   : > { %v970_v60 = vpop.f32.mrb[0].mxu1 }
 0x26b   : > { %v660_v62 = vadd.f32 %v970_v60, %v519_v58  ;;  %v627_v63 = vpop.f32.mrb[1].mxu1 }
 0x26c   : > { %v658_v1 = vadd.f32 %v627_v63, %v517_v59  ;;  %v971_v2 = vpop.f32.mrb[2].mxu1 }
 0x26d   : > { %668 = vst [vmem:[#allocation2 + $0x10] sm:$0xff] %v660_v62  ;;  %v661_v3 = vadd.f32 %v971_v2, %v520_v61  ;;  %v630_v4 = vpop.f32.mrb[3].mxu1 }
 0x26e   : > { %666 = vst [vmem:[#allocation2] sm:$0xff] %v658_v1  ;;  %v659_v5 = vadd.f32 %v630_v4, %v518_v0 }
 0x26f   : > { %669 = vst [vmem:[#allocation2 + $0x18] sm:$0xff] %v661_v3 }
 0x270   : > { %667 = vst [vmem:[#allocation2 + $0x8] sm:$0xff] %v659_v5 }
 0x272   : > { %v974_v8 = vpop.f32.mrb[4].mxu1  ;;  %677 = sbr.rel (%p894_p2) target bundleno = 643 (0x283), region = 60 }
 0x273   : > { %v664_v10 = vadd.f32 %v974_v8, %v523_v6  ;;  %v643_v11 = vpop.f32.mrb[5].mxu1 }
 0x274   : > { %v662_v13 = vadd.f32 %v643_v11, %v521_v7  ;;  %v975_v14 = vpop.f32.mrb[6].mxu1  ;;  %v680_v23 = vld [vmem:[#allocation2 + $0x10] sm:$0xff] (!%p894_p2) }
 0x275   : > { %672 = vst [vmem:[#allocation2 + $0x30] sm:$0xff] %v664_v10  ;;  %v665_v15 = vadd.f32 %v975_v14, %v524_v9  ;;  %v646_v16 = vpop.f32.mrb[7].mxu1  ;;  %v678_v18 = vld [vmem:[#allocation2] sm:$0xff] (!%p894_p2)  ;;  %v695_v26 = vadd.f32 (!%p894_p2), %v895_v19, %v680_v23 }
 0x276   : > { %670 = vst [vmem:[#allocation2 + $0x20] sm:$0xff] %v662_v13  ;;  %v663_v17 = vadd.f32 %v646_v16, %v522_v12  ;;  %v693_v21 = vadd.f32 (!%p894_p2), %v895_v19, %v678_v18  ;;  %v681_v24 = vld [vmem:[#allocation2 + $0x18] sm:$0xff] (!%p894_p2) }
 0x277   : > { %673 = vst [vmem:[#allocation2 + $0x38] sm:$0xff] %v665_v15  ;;  %v679_v20 = vld [vmem:[#allocation2 + $0x8] sm:$0xff] (!%p894_p2)  ;;  %v696_v27 = vadd.f32 (!%p894_p2), %v895_v19, %v681_v24  ;;  %703 = vst [vmem:[%s1679_s4 + $0x10] sm:$0xff] (!%p894_p2), %v695_v26 }
 0x278   : > { %671 = vst [vmem:[#allocation2 + $0x28] sm:$0xff] %v663_v17  ;;  %v694_v22 = vadd.f32 (!%p894_p2), %v895_v19, %v679_v20  ;;  %701 = vst [vmem:[%s1679_s4] sm:$0xff] (!%p894_p2), %v693_v21 }
 0x279   : > { %704 = vst [vmem:[%s1679_s4 + $0x18] sm:$0xff] %v696_v27 }
 0x27a   : > { %702 = vst [vmem:[%s1679_s4 + $0x8] sm:$0xff] %v694_v22 }
 0x27c   : > { %v684_v30 = vld [vmem:[#allocation2 + $0x30] sm:$0xff] }
 0x27d   : > { %v682_v25 = vld [vmem:[#allocation2 + $0x20] sm:$0xff]  ;;  %v699_v33 = vadd.f32 %v895_v19, %v684_v30 }
 0x27e   : > { %v697_v28 = vadd.f32 %v895_v19, %v682_v25  ;;  %v685_v31 = vld [vmem:[#allocation2 + $0x38] sm:$0xff] }
 0x27f   : > { %v683_v29 = vld [vmem:[#allocation2 + $0x28] sm:$0xff]  ;;  %v700_v34 = vadd.f32 %v895_v19, %v685_v31  ;;  %707 = vst [vmem:[%s1679_s4 + $0x30] sm:$0xff] %v699_v33 }
 0x280   : > { %v698_v32 = vadd.f32 %v895_v19, %v683_v29  ;;  %705 = vst [vmem:[%s1679_s4 + $0x20] sm:$0xff] %v697_v28 }
 0x281   : > { %708 = vst [vmem:[%s1679_s4 + $0x38] sm:$0xff] %v700_v34 }
 0x282   : > { %706 = vst [vmem:[%s1679_s4 + $0x28] sm:$0xff] %v698_v32 }
 0x283 PF: > { %s1849_s24 = sld [smem:[#allocation15_spill]]  ;;  %s723_s9 = sshll.u32 %s1679_s4, 4  ;;  %s1730_s9 = int_to_ptr.vmem [resolvable:$true] %s723_s9 }
 0x284   : > { %s1850_s6 = sld [smem:[#allocation23_spill]]  ;;  %s710_s10 = scalar_lea.sflag [#allocation5], %s1651_s14 }
 0x285   : > { %s1201_s18 = scalar_lea.vmem %s1730_s9, 1024  ;;  %p1851_p11 = scmp.ne.s32.totalorder %s1835_s17, 0 }
 0x286   : > { %p1202_p13 = scmp.ne.s32.totalorder %s1730_s9, %s1201_s18  ;;  %s1337_s20 = smov [#allocation9]  }
 0x287   : > { %s1205_s30 = sshll.u32 %s1337_s20, 4  ;;  %s1206_s30 = int_to_ptr.vmem [resolvable:$false] %s1205_s30 }
 0x288   : > { %p1203_p6 = pnand %p1202_p13, %p1851_p11  ;;  %s1207_s23 = scalar_lea.vmem %s1206_s30, 2048 }
 0x289   : > { %s903_s27 = sshll.u32 %s1849_s24, 10  ;;  %p1208_p1 = scmp.lt.s32.totalorder %s1730_s9, %s1206_s30 }
 0x28a   : > { %s1727_s8 = scalar_lea.hbm %s1850_s6, %s903_s27  ;;  %p1204_p5 = pneg %p1203_p6 }
 0x28b   : > { %p1209_p0 = scmp.lt.s32.totalorder %s1207_s23, %s1201_s18 }
 0x28d   : > { %p1210_p9 = por %p1209_p0, %p1208_p1 }
 0x28f   : > { %p1211_p12 = pnand %p1210_p9, %p1204_p5 }
 0x291   : > { %1214 = shalt.err (!%p1211_p12)
}
 0x292   : > { %s1215_s13 = scalar_lea.hbm %s1727_s8, 1024  ;;  %s1219_s16 = scalar_lea.hbm %s1850_s6, 4096 }
 0x293   : > { %p1216_p3 = scmp.ne.s32.totalorder %s1727_s8, %s1215_s13  ;;  %p1220_p8 = scmp.lt.u32.totalorder %s1727_s8, %s1850_s6 }
 0x294   : > { %p1221_p10 = scmp.lt.u32.totalorder %s1219_s16, %s1215_s13  ;;  %p1223_p13 = scmp.lt.u32.totalorder %s1215_s13, %s1727_s8 }
 0x295   : > { %p1217_p4 = pnand %p1216_p3, %p1851_p11 }
 0x296   : > { %p1222_p2 = por %p1221_p10, %p1220_p8 }
 0x297   : > { %p1218_p7 = pneg %p1217_p4 }
 0x298   : > { %p1224_p6 = por %p1223_p13, %p1222_p2 }
 0x29a   : > { %p1225_p5 = pnand %p1224_p6, %p1218_p7 }
 0x29c   : > { %1228 = shalt.err (!%p1225_p5)
}
 0x29d   : > { %s1338_s29 = smov 128   ;;  %s1339_s1 = smov 8  }
 0x29e   : > { %982 = dma.vmem_to_hbm [thread:$0]  (%p1851_p11), %s1730_s9, 1024, %s1727_s8, %s710_s10, %s1338_s29, %s1338_s29, %s1339_s1  }
 0x29f PF: > { %p999_p1 = scmp.ge.s32.totalorder %s1327_s28, 2  ;;  %s738_s24 = sand.u32 1, %s1299_s21  }
 0x2a0   : > { %p1852_p0 = scmp.ne.s32.totalorder %s1837_s5, 0  ;;  %s739_s27 = scalar_lea.sflag [#allocation5], %s738_s24 }
 0x2a2   : > { %p995_p9 = pnand %p999_p1, %p1852_p0 }
 0x2a4   : > { %1282 = dma.done.wait (!%p995_p9), %s739_s27, 1024  }
 0x2a5   : > { %1284 = vsyncadd (!%p995_p9), %s739_s27, 4294966272  ;;  %s24_s28 = sadd.s32 1, %s1327_s28   ;;  %s1853_s15 = sld [smem:[#allocation13_spill]] }
 0x2a6   : > { %p21_p12 = scmp.ge.s32.totalorder %s24_s28, 10   ;;  %s1854_s20 = sld [smem:[#allocation18_spill]] }
 0x2a7   : > { %s1855_s17 = sld [smem:[#allocation14_spill]]  ;;  %s1856_s23 = sld [smem:[#allocation20_spill]] }
 0x2a8   : > { %s1857_s25 = sld [smem:[#allocation16_spill]]  ;;  %s1858_s14 = sld [smem:[#allocation17_spill]] }
 0x2a9   : > { %s1859_s27 = sld [smem:[#allocation19_spill]]  ;;  %s1860_s18 = smov %s1291_s19 }
 0x2aa   : > { %s1862_s21 = smov %s1303_s22  ;;  %s1864_s24 = smov %s1319_s26 }
 0x2ab   : > { %s1861_s19 = smov %s1853_s15  ;;  %23 = sbr.rel (!%p21_p12) target bundleno = 15 (0xf), region = 120 }
 0x2ad   : > { %s1863_s22 = smov %s1855_s17 }
 0x2ae   : > { %s1865_s26 = smov %s1858_s14 }
 0x2b2   :  { %744 = vsyncpa [#allocation4], 1 }
 0x2b3   :  { %746 = vsyncpa [#allocation4 + $0x1], 1 }
 0x2b4   :  { %747 = vsyncpa [#allocation7], 1 }
 0x2b5   :  { %749 = vsyncpa [#allocation7 + $0x1], 1 }
 0x2b6   :  { %750 = vsyncpa [#allocation5], 1 }
 0x2b7   :  { %752 = vsyncpa [#allocation5 + $0x1], 1 }

</bundles_post_ra>
